<compile_context>
chip_gen: v6e
topology: v6e:2x2x1
jax: 0.10.0
libtpu: 0.0.40
codegen_flags: <defaults>
</compile_context>

<pallas_src>
import functools

import jax
import jax.numpy as jnp
from jax.experimental import pallas as pl
from jax.experimental.pallas import tpu as pltpu


def _round_up(v, m):
    return (v + m - 1) // m * m


def _vmem_limit_bytes():
    """Per-generation scoped-VMEM limit with headroom (v7x 64 MiB, v5e/v6e 128 MiB)."""
    cap = 64 * 1024 * 1024
    try:
        info = pltpu.get_tpu_info()
        cap = int(getattr(info, "vmem_capacity_bytes", cap))
    except Exception:
        pass  # fall back to the most conservative (v7x per-TC) capacity
    return int(max(32 * 1024 * 1024, min(cap * 3 // 4, 100 * 1024 * 1024)))


def _pooled_linear_kernel(batch_ref, x_ref, w_ref, b_ref, o_ref, sums_ref,
                          *, apply_relu, count_col):
    """Grid over N tiles: accumulate segment sums, finalize on the last step.

    batch_ref: (1, TN) int32      x_ref: (TN, F_pad)   w_ref: (F_pad, OUT_pad)
    b_ref:     (1, OUT_pad)       o_ref: (B_pad, OUT_pad)
    sums_ref:  (B_pad, F_pad) f32 scratch; column `count_col` holds node counts
               (x carries a ones column there, the matching weight row is 0).
    """
    n = pl.program_id(0)

    @pl.when(n == 0)
    def _init():
        sums_ref[...] = jnp.zeros_like(sums_ref)

    batch = batch_ref[...]                                    # (1, TN) int32
    x = x_ref[...]                                            # (TN, F_pad)
    b_pad = sums_ref.shape[0]
    tn = x_ref.shape[0]

    # one-hot segment matrix in x's dtype (0/1 exact in bf16); f32 accumulation
    # comes from preferred_element_type on the MXU.
    seg_ids = jax.lax.broadcasted_iota(jnp.int32, (b_pad, tn), 0)
    onehot = (seg_ids == batch).astype(x.dtype)               # (B_pad, TN)
    sums_ref[...] += jnp.dot(onehot, x, preferred_element_type=jnp.float32)

    @pl.when(n == pl.num_programs(0) - 1)
    def _finalize():
        sums = sums_ref[...]                                  # (B_pad, F_pad) f32
        counts = sums[:, count_col:count_col + 1]             # (B_pad, 1)
        w = w_ref[...]
        if w.dtype != jnp.float32:
            w = w.astype(jnp.float32)
        # deferred mean normalization: (sums @ W) * (1 / counts) + b
        y = jnp.dot(sums, w, preferred_element_type=jnp.float32)
        inv = pl.reciprocal(jnp.maximum(counts, 1.0), approx=False)
        y = y * inv + b_ref[...]
        if apply_relu:
            y = jnp.maximum(y, 0.0)
        o_ref[...] = y.astype(o_ref.dtype)


def _linear_kernel(x_ref, w_ref, b_ref, o_ref, *, apply_relu):
    """Direct path (x already has batch_size rows): row-tiled linear (+ relu)."""
    y = jnp.dot(x_ref[...], w_ref[...], preferred_element_type=jnp.float32)
    y = y + b_ref[...]
    if apply_relu:
        y = jnp.maximum(y, 0.0)
    o_ref[...] = y.astype(o_ref.dtype)


def tox21_linear(x, batch, weight, bias, *, batch_size, activation=True,
                 pool_in_bf16=False):
    """Pallas equivalent of Tox21Linear.forward.

    x      : [N, F]  node features
    batch  : [N]     int32 graph id per node (ignored if N == batch_size)
    weight : [F, OUT]
    bias   : [OUT]
    pool_in_bf16: stream node features in bf16 for the pooled path (halves HBM
                  traffic; accumulation stays f32). Slightly changes numerics.
    returns: [batch_size, OUT] if pooling happened, else [N, OUT]
    """
    N, F = x.shape
    OUT = weight.shape[1]
    OUT_pad = _round_up(OUT, 128)                       # lane-dense output
    vmem_limit = _vmem_limit_bytes()

    if N != batch_size:
        # ---------------- pooled path: segment-mean + linear (+ relu) --------
        B = batch_size
        x_dtype = jnp.bfloat16 if pool_in_bf16 else x.dtype
        itemsize = jnp.dtype(x_dtype).itemsize
        # bf16 packs 16 sublanes per vreg -> pad B to 16 so the one-hot LHS
        # fills packed vregs; 8 is enough for f32.
        B_pad = _round_up(B, 16 if itemsize == 2 else 8)

        # F padding: +1 column of ones (folded counts), then round to 128.
        F_pad = _round_up(F + 1, 128)
        count_col = F

        # -------- TN from an explicit VMEM budget (per generation) ----------
        # Double-buffered consumers: x tile, batch-id tile, weight, bias, out.
        fixed = (2 * F_pad * OUT_pad * 4          # weight (double-buffered)
                 + 2 * OUT_pad * 4                # bias
                 + B_pad * F_pad * 4              # sums scratch
                 + 2 * B_pad * OUT_pad * 4)       # output block
        budget = vmem_limit - fixed - (4 << 20)   # headroom for compiler scratch
        per_row = F_pad * itemsize + 4            # one x row + one batch id
        tn_cap = max(128, (budget // (2 * per_row)) // 128 * 128)

        tn = _round_up(max((4 << 20) // (F_pad * itemsize), 1), 128)  # ~4 MiB tile
        tn = max(512, min(tn, 8192))              # amortize ~0.35us/step overhead
        tn = min(tn, tn_cap)                      # respect VMEM budget
        tn = min(tn, _round_up(N, 128))           # never exceed the node count
        TN = max(tn, 128)

        N_pad = _round_up(N, TN)

        # x augmented with a ones column (counts) then zero-padded; padded node
        # rows are all-zero and get batch id -1, so they contribute nothing.
        x_aug = jnp.concatenate(
            [x.astype(x_dtype), jnp.ones((N, 1), dtype=x_dtype)], axis=1)
        x_pad = jnp.pad(x_aug, ((0, N_pad - N), (0, F_pad - (F + 1))))
        batch_pad = jnp.pad(batch.astype(jnp.int32), (0, N_pad - N),
                            constant_values=-1).reshape(1, N_pad)
        # weight rows >= F are zero -> the ones column does not leak into y.
        w_pad = jnp.pad(weight.astype(jnp.float32),
                        ((0, F_pad - F), (0, OUT_pad - OUT)))
        b_row = jnp.pad(bias.astype(jnp.float32),
                        (0, OUT_pad - OUT)).reshape(1, OUT_pad)

        kernel = functools.partial(_pooled_linear_kernel,
                                   apply_relu=activation, count_col=count_col)
        flops = 2 * B_pad * N_pad * F_pad + 2 * B_pad * F_pad * OUT_pad
        bytes_accessed = (N_pad * (F_pad * itemsize + 4)
                          + F_pad * OUT_pad * 4 + OUT_pad * 4
                          + B_pad * OUT_pad * 4)

        out = pl.pallas_call(
            kernel,
            out_shape=jax.ShapeDtypeStruct((B_pad, OUT_pad), jnp.float32),
            grid_spec=pltpu.PrefetchScalarGridSpec(
                num_scalar_prefetch=0,
                grid=(N_pad // TN,),
                in_specs=[
                    pl.BlockSpec((1, TN), lambda n: (0, n)),         # batch ids
                    pl.BlockSpec((TN, F_pad), lambda n: (n, 0)),     # x tile
                    pl.BlockSpec((F_pad, OUT_pad), lambda n: (0, 0)),  # weight
                    pl.BlockSpec((1, OUT_pad), lambda n: (0, 0)),    # bias
                ],
                out_specs=pl.BlockSpec((B_pad, OUT_pad), lambda n: (0, 0)),
                scratch_shapes=[
                    pltpu.VMEM((B_pad, F_pad), jnp.float32),         # segment sums
                ]),
            compiler_params=pltpu.CompilerParams(
                dimension_semantics=("arbitrary",),                  # N reduction
                vmem_limit_bytes=vmem_limit),
            cost_estimate=pl.CostEstimate(
                flops=flops, transcendentals=0, bytes_accessed=bytes_accessed),
        )(batch_pad, x_pad, w_pad, b_row)
        return out[:B, :OUT]

    # ---------------- direct path: N == batch_size -> just linear (+ relu) ---
    F_pad = _round_up(F, 128)
    TM = min(512, _round_up(N, 8))
    N_pad = _round_up(N, TM)
    x_pad = jnp.pad(x, ((0, N_pad - N), (0, F_pad - F)))
    w_pad = jnp.pad(weight.astype(jnp.float32),
                    ((0, F_pad - F), (0, OUT_pad - OUT)))
    b_row = jnp.pad(bias.astype(jnp.float32),
                    (0, OUT_pad - OUT)).reshape(1, OUT_pad)

    kernel = functools.partial(_linear_kernel, apply_relu=activation)
    flops = 2 * N_pad * F_pad * OUT_pad
    bytes_accessed = (N_pad * F_pad * x.dtype.itemsize + F_pad * OUT_pad * 4
                      + OUT_pad * 4 + N_pad * OUT_pad * 4)

    out = pl.pallas_call(
        kernel,
        out_shape=jax.ShapeDtypeStruct((N_pad, OUT_pad), jnp.float32),
        grid_spec=pltpu.PrefetchScalarGridSpec(
            num_scalar_prefetch=0,
            grid=(N_pad // TM,),
            in_specs=[
                pl.BlockSpec((TM, F_pad), lambda i: (i, 0)),
                pl.BlockSpec((F_pad, OUT_pad), lambda i: (0, 0)),
                pl.BlockSpec((1, OUT_pad), lambda i: (0, 0)),
            ],
            out_specs=pl.BlockSpec((TM, OUT_pad), lambda i: (i, 0))),
        compiler_params=pltpu.CompilerParams(
            dimension_semantics=("parallel",),
            vmem_limit_bytes=vmem_limit),
        cost_estimate=pl.CostEstimate(
            flops=flops, transcendentals=0, bytes_accessed=bytes_accessed),
    )(x_pad, w_pad, b_row)
    return out[:N, :OUT]


def _reference(x, batch, weight, bias, batch_size, activation=True):
    N = x.shape[0]
    if N != batch_size:
        onehot = (jnp.arange(batch_size)[:, None] == batch[None, :]).astype(jnp.float32)
        counts = jnp.maximum(onehot.sum(axis=1, keepdims=True), 1.0)
        x = (onehot @ x) / counts
    y = x @ weight + bias
    return jnp.maximum(y, 0.0) if activation else y


if __name__ == "__main__":
    key = jax.random.PRNGKey(0)
    k_x, k_b, k_w, k_bias = jax.random.split(key, 4)

    # small shapes: 16 nodes, 32 features, 4 graphs, 8 output channels
    N, F, B, OUT = 16, 32, 4, 8

    x = jax.random.normal(k_x, (N, F), dtype=jnp.float32)
    batch = jnp.sort(jax.random.randint(k_b, (N,), 0, B, dtype=jnp.int32))

    # deterministic "exnn.Linear(OUT)" params (in_features inferred = F)
    bound = 1.0 / jnp.sqrt(jnp.float32(F))
    weight = jax.random.uniform(k_w, (F, OUT), jnp.float32, -bound, bound)
    bias = jax.random.uniform(k_bias, (OUT,), jnp.float32, -bound, bound)

    # pool path, activation=True
    out = jax.block_until_ready(
        tox21_linear(x, batch, weight, bias, batch_size=B, activation=True))
    ref = _reference(x, batch, weight, bias, B, activation=True)
    assert out.shape == (B, OUT)
    assert jnp.allclose(out, ref, atol=1e-5, rtol=1e-5), "pool+relu mismatch"

    # pool path, activation=False
    out_na = jax.block_until_ready(
        tox21_linear(x, batch, weight, bias, batch_size=B, activation=False))
    ref_na = _reference(x, batch, weight, bias, B, activation=False)
    assert jnp.allclose(out_na, ref_na, atol=1e-5, rtol=1e-5), "pool no-relu mismatch"

    # pool path with bf16 node-feature streaming (looser tolerance)
    out_bf = jax.block_until_ready(
        tox21_linear(x, batch, weight, bias, batch_size=B, activation=True,
                     pool_in_bf16=True))
    assert jnp.allclose(out_bf, ref, atol=3e-2, rtol=3e-2), "bf16 pool mismatch"

    # direct path: x already has batch_size rows -> no pooling
    x_small = jax.random.normal(k_x, (B, F), dtype=jnp.float32)
    out_d = jax.block_until_ready(
        tox21_linear(x_small, batch[:B], weight, bias, batch_size=B, activation=True))
    ref_d = _reference(x_small, batch[:B], weight, bias, B, activation=True)
    assert out_d.shape == (B, OUT)
    assert jnp.allclose(out_d, ref_d, atol=1e-5, rtol=1e-5), "direct path mismatch"

    print("KERNEL_OK")
</pallas_src>

<mosaic_0001>
module attributes {stable_mosaic.version = 11 : i64} {
  func.func @_pooled_linear_kernel(%arg0: i32, %arg1: memref<1x128xi32, #tpu.memory_space<vmem>>, %arg2: memref<128x128xf32, #tpu.memory_space<vmem>>, %arg3: memref<128x128xf32, #tpu.memory_space<vmem>>, %arg4: memref<1x128xf32, #tpu.memory_space<vmem>>, %arg5: memref<8x128xf32, #tpu.memory_space<vmem>>, %arg6: memref<8x128xf32, #tpu.memory_space<vmem>>) attributes {dimension_semantics = [#tpu.dimension_semantics<arbitrary>], iteration_bounds = array<i64: 1>, scalar_prefetch = 0 : i64, scratch_operands = 1 : i64, tpu.core_type = #tpu.core_type<tc>, window_params = [{transform_indices = @transform_0, window_bounds = array<i64: 1, 128>}, {transform_indices = @transform_1, window_bounds = array<i64: 128, 128>}, {pipeline_mode = #tpu.pipeline_mode<synchronous>, transform_indices = @transform_2, window_bounds = array<i64: 128, 128>}, {pipeline_mode = #tpu.pipeline_mode<synchronous>, transform_indices = @transform_3, window_bounds = array<i64: 1, 128>}, {pipeline_mode = #tpu.pipeline_mode<synchronous>, transform_indices = @transform_4, window_bounds = array<i64: 8, 128>}]} {
    %c0_i32 = arith.constant 0 : i32
    %0 = arith.cmpi eq, %arg0, %c0_i32 : i32
    %1 = arith.extui %0 : i1 to i32
    %c0_i32_0 = arith.constant 0 : i32
    %2 = arith.cmpi ne, %1, %c0_i32_0 : i32
    scf.if %2 {
      %cst_10 = arith.constant 0.000000e+00 : f32
      %17 = vector.broadcast %cst_10 : f32 to vector<8x128xf32>
      %c0_11 = arith.constant 0 : index
      %c0_12 = arith.constant 0 : index
      %18 = vector.load %arg6[%c0_11, %c0_12] : memref<8x128xf32, #tpu.memory_space<vmem>>, vector<8x128xf32>
      tpu.vector_store %arg6[%c0_11, %c0_12], %17 {strides = array<i32>} : memref<8x128xf32, #tpu.memory_space<vmem>>, vector<8x128xf32>,
    } else {
    }
    %c0 = arith.constant 0 : index
    %c0_1 = arith.constant 0 : index
    %3 = vector.load %arg1[%c0, %c0_1] : memref<1x128xi32, #tpu.memory_space<vmem>>, vector<1x128xi32>
    %c0_2 = arith.constant 0 : index
    %c0_3 = arith.constant 0 : index
    %4 = vector.load %arg2[%c0_2, %c0_3] : memref<128x128xf32, #tpu.memory_space<vmem>>, vector<128x128xf32>
    %5 = tpu.iota {dimensions = array<i32: 0>} : vector<8x128xi32>
    %6 = vector.broadcast %3 : vector<1x128xi32> to vector<8x128xi32>
    %7 = arith.cmpi eq, %5, %6 : vector<8x128xi32>
    %8 = arith.extui %7 : vector<8x128xi1> to vector<8x128xi32>
    %9 = arith.sitofp %8 : vector<8x128xi32> to vector<8x128xf32>
    %c0_4 = arith.constant 0 : index
    %c0_5 = arith.constant 0 : index
    %10 = vector.load %arg6[%c0_4, %c0_5] : memref<8x128xf32, #tpu.memory_space<vmem>>, vector<8x128xf32>
    %cst = arith.constant dense<0.000000e+00> : vector<8x128xf32>
    %11 = tpu.matmul %9, %4, %cst {dimension_numbers = #tpu.dot_dimension_numbers<[1], [0], [0], [1], [0, 0, 1, 1], [], []>} : vector<8x128xf32>, vector<128x128xf32>, vector<8x128xf32> -> vector<8x128xf32>
    %12 = arith.addf %10, %11 : vector<8x128xf32>
    %c0_6 = arith.constant 0 : index
    %c0_7 = arith.constant 0 : index
    %13 = vector.load %arg6[%c0_6, %c0_7] : memref<8x128xf32, #tpu.memory_space<vmem>>, vector<8x128xf32>
    tpu.vector_store %arg6[%c0_6, %c0_7], %12 {strides = array<i32>} : memref<8x128xf32, #tpu.memory_space<vmem>>, vector<8x128xf32>,
    %c0_i32_8 = arith.constant 0 : i32
    %14 = arith.cmpi eq, %arg0, %c0_i32_8 : i32
    %15 = arith.extui %14 : i1 to i32
    %c0_i32_9 = arith.constant 0 : i32
    %16 = arith.cmpi ne, %15, %c0_i32_9 : i32
    scf.if %16 {
      %c0_10 = arith.constant 0 : index
      %c0_11 = arith.constant 0 : index
      %17 = vector.load %arg6[%c0_10, %c0_11] : memref<8x128xf32, #tpu.memory_space<vmem>>, vector<8x128xf32>
      %18 = vector.extract_strided_slice %17 {offsets = [0, 32], sizes = [8, 1], strides = [1, 1]} : vector<8x128xf32> to vector<8x1xf32>
      %c0_12 = arith.constant 0 : index
      %c0_13 = arith.constant 0 : index
      %19 = vector.load %arg3[%c0_12, %c0_13] : memref<128x128xf32, #tpu.memory_space<vmem>>, vector<128x128xf32>
      %cst_14 = arith.constant dense<0.000000e+00> : vector<8x128xf32>
      %20 = tpu.matmul %17, %19, %cst_14 {dimension_numbers = #tpu.dot_dimension_numbers<[1], [0], [0], [1], [0, 0, 1, 1], [], []>} : vector<8x128xf32>, vector<128x128xf32>, vector<8x128xf32> -> vector<8x128xf32>
      %cst_15 = arith.constant 1.000000e+00 : f32
      %21 = vector.broadcast %cst_15 : f32 to vector<8x1xf32>
      %22 = arith.maximumf %18, %21 : vector<8x1xf32>
      %23 = tpu.reciprocal %22 : vector<8x1xf32> -> vector<8x1xf32>
      %24 = vector.broadcast %23 : vector<8x1xf32> to vector<8x128xf32>
      %25 = arith.mulf %20, %24 : vector<8x128xf32>
      %c0_16 = arith.constant 0 : index
      %c0_17 = arith.constant 0 : index
      %26 = vector.load %arg4[%c0_16, %c0_17] : memref<1x128xf32, #tpu.memory_space<vmem>>, vector<1x128xf32>
      %27 = vector.broadcast %26 : vector<1x128xf32> to vector<8x128xf32>
      %28 = arith.addf %25, %27 : vector<8x128xf32>
      %cst_18 = arith.constant 0.000000e+00 : f32
      %29 = vector.broadcast %cst_18 : f32 to vector<8x128xf32>
      %30 = arith.maximumf %28, %29 : vector<8x128xf32>
      %c0_19 = arith.constant 0 : index
      %c0_20 = arith.constant 0 : index
      %31 = vector.load %arg5[%c0_19, %c0_20] : memref<8x128xf32, #tpu.memory_space<vmem>>, vector<8x128xf32>
      tpu.vector_store %arg5[%c0_19, %c0_20], %30 {strides = array<i32>} : memref<8x128xf32, #tpu.memory_space<vmem>>, vector<8x128xf32>,
    } else {
    }
    return
  }
  func.func @transform_0(%arg0: i32) -> (i32, i32) {
    %c0_i32 = arith.constant 0 : i32
    %c0_i32_0 = arith.constant 0 : i32
    return %c0_i32, %arg0 : i32, i32
  }
  func.func @transform_1(%arg0: i32) -> (i32, i32) {
    %c0_i32 = arith.constant 0 : i32
    %c0_i32_0 = arith.constant 0 : i32
    return %arg0, %c0_i32 : i32, i32
  }
  func.func @transform_2(%arg0: i32) -> (i32, i32) {
    %c0_i32 = arith.constant 0 : i32
    %c0_i32_0 = arith.constant 0 : i32
    %c0_i32_1 = arith.constant 0 : i32
    return %c0_i32, %c0_i32_0 : i32, i32
  }
  func.func @transform_3(%arg0: i32) -> (i32, i32) {
    %c0_i32 = arith.constant 0 : i32
    %c0_i32_0 = arith.constant 0 : i32
    %c0_i32_1 = arith.constant 0 : i32
    return %c0_i32, %c0_i32_0 : i32, i32
  }
  func.func @transform_4(%arg0: i32) -> (i32, i32) {
    %c0_i32 = arith.constant 0 : i32
    %c0_i32_0 = arith.constant 0 : i32
    %c0_i32_1 = arith.constant 0 : i32
    return %c0_i32, %c0_i32_0 : i32, i32
  }
}

</mosaic_0001>

<bundles_post_ra>
// kernel: tpu_custom_call.1
= control target key start
LH: loop header
LB: loop body
LE: loop exit
PB: predicated region body
PF: predicated region fallthrough
CT: control target
= control target key end

     0   :  { %9 = vsyncpa [#allocation4], 0  ;;  %s576_s0 = inlined_call_operand.hbm [shape: s32[1,128], index: 0, kind: input, shape index: {}]   ;;  %s577_s1 = inlined_call_operand.hbm [shape: f32[128,128], index: 1, kind: input, shape index: {}]   ;;  %s578_s2 = inlined_call_operand.hbm [shape: f32[128,128], index: 2, kind: input, shape index: {}]   ;;  %s579_s3 = inlined_call_operand.vmem [shape: f32[1,128], index: 3, kind: input, shape index: {}]   ;;  %s580_s4 = inlined_call_operand.hbm [shape: f32[8,128], index: 4, kind: output, shape index: {}]  }
   0x1   :  { %10 = vsyncpa [#allocation7], 0 }
   0x2   :  { %11 = vsyncpa [#allocation5], 0  ;;  %s492_s15 = smov [#allocation6]  }
   0x3   :  { %s27_s16 = sshll.u32 %s492_s15, 4  ;;  %s28_s16 = int_to_ptr.vmem [resolvable:$true] %s27_s16 }
   0x4   :  { %s414_s17 = scalar_lea.vmem %s28_s16, 2048  ;;  %p419_p1 = scmp.lt.s32.totalorder %s28_s16, %s28_s16 }
   0x5   :  { %p415_p0 = scmp.ne.s32.totalorder %s28_s16, %s414_s17  ;;  %p420_p2 = scmp.lt.s32.totalorder %s414_s17, %s414_s17 }
   0x7   :  { %p421_p3 = por %p420_p2, %p419_p1 }
   0x9   :  { %p422_p4 = pnand %p421_p3, %p415_p0 }
   0xb   :  { %425 = shalt.err (!%p422_p4)
}
   0xc   :  { %s493_s18 = smov 128   ;;  %s494_s19 = smov 8  }
   0xd   :  { %33 = dma.hbm_to_vmem [thread:$0]  %s577_s1, 2048, %s28_s16, [#allocation7], %s493_s18, %s493_s18, %s494_s19  }
   0xe   :  { %s495_s22 = smov [#allocation3]   ;;  %s496_s24 = smov [#allocation8]  }
   0xf   :  { %s18_s23 = sshll.u32 %s495_s22, 4  ;;  %s39_s25 = sshll.u32 %s496_s24, 4  ;;  %s19_s23 = int_to_ptr.vmem [resolvable:$true] %s18_s23  ;;  %s40_s25 = int_to_ptr.vmem [resolvable:$true] %s39_s25 }
  0x10   :  { %s434_s26 = scalar_lea.vmem %s19_s23, 16  ;;  %s438_s27 = scalar_lea.vmem %s19_s23, 32 }
  0x11   :  { %p435_p5 = scmp.ne.s32.totalorder %s19_s23, %s434_s26  ;;  %p439_p6 = scmp.lt.s32.totalorder %s19_s23, %s19_s23 }
  0x12   :  { %p440_p7 = scmp.lt.s32.totalorder %s438_s27, %s434_s26 }
  0x14   :  { %p441_p8 = por %p440_p7, %p439_p6 }
  0x16   :  { %p442_p9 = pnand %p441_p8, %p435_p5 }
  0x18   :  { %445 = shalt.err (!%p442_p9)
}
  0x19   :  { %21 = dma.hbm_to_vmem [thread:$0]  %s576_s0, 16, %s19_s23, [#allocation4]  }
  0x1a   :  { %s454_s30 = scalar_lea.vmem %s40_s25, 2048  ;;  %p459_p11 = scmp.lt.s32.totalorder %s40_s25, %s40_s25 }
  0x1b   :  { %p455_p10 = scmp.ne.s32.totalorder %s40_s25, %s454_s30  ;;  %p460_p12 = scmp.lt.s32.totalorder %s454_s30, %s454_s30 }
  0x1d   :  { %p461_p13 = por %p460_p12, %p459_p11 }
  0x1f   :  { %p462_p0 = pnand %p461_p13, %p455_p10 }
  0x21   :  { %465 = shalt.err (!%p462_p0)
}
  0x22   :  { %45 = dma.hbm_to_vmem [thread:$0]  %s578_s2, 2048, %s40_s25, [#allocation7], %s493_s18, %s493_s18, %s494_s19  }
  0x23   :  { %486 = dma.done.wait [#allocation4], 16  }
  0x24   :  { %487 = vsyncadd [#allocation4], 4294967280 }
  0x25   :  { %488 = dma.done.wait [#allocation7], 4096  }
  0x26   :  { %489 = vsyncadd [#allocation7], 4294963200  ;;  %v497_v0 = vmov 0.0   ;;  %vm498_vm0 = vmmov 0   ;;  %v78_v1 = vld [vmem:[#allocation6 + $0x78] sm:$0xff]  ;;  %v77_v2 = vld [vmem:[#allocation6 + $0x70] sm:$0xff]  ;;  %v79_v22 = vlaneseq }
  0x27   :  { %323 = vmatprep.subr.mxu0 %v497_v0  ;;  %355 = vmatprep.mubr.msk.f32.mxu0 %vm498_vm0, %v497_v0  ;;  %v76_v3 = vld [vmem:[#allocation6 + $0x68] sm:$0xff]  ;;  %v75_v4 = vld [vmem:[#allocation6 + $0x60] sm:$0xff]  ;;  %v180_v5 = vld [vmem:[#allocation8 + $0x78] sm:$0xff]  ;;  %v499_v35 = vmov 1.0   ;;  %v500_v37 = vmov 32   ;;  %s501_s6 = smov [#allocation9]  }
  0x28   :  { %358 = vmatprep.subr.mxu1 %v497_v0  ;;  %390 = vmatprep.mubr.msk.f32.mxu1 %vm498_vm0, %v497_v0  ;;  %v74_v6 = vld [vmem:[#allocation6 + $0x58] sm:$0xff]  ;;  %v179_v7 = vld [vmem:[#allocation8 + $0x70] sm:$0xff]  ;;  %v178_v8 = vld [vmem:[#allocation8 + $0x68] sm:$0xff]  ;;  %v80_v27 = vshrl.u32 %v79_v22, 7  ;;  %s275_s7 = sshll.u32 %s501_s6, 4  ;;  %s276_s7 = int_to_ptr.vmem [resolvable:$true] %s275_s7 }
  0x29   :  { %324 = vmatpush3.msra.mxu0 %v78_v1  ;;  %359 = vmatpush3.msra.mxu1 %v180_v5  ;;  %v73_v9 = vld [vmem:[#allocation6 + $0x50] sm:$0xff]  ;;  %v177_v10 = vld [vmem:[#allocation8 + $0x60] sm:$0xff]  ;;  %v72_v11 = vld [vmem:[#allocation6 + $0x48] sm:$0xff]  ;;  %s466_s8 = scalar_lea.vmem %s276_s7, 128  ;;  %p471_p2 = scmp.lt.s32.totalorder %s276_s7, %s276_s7 }
  0x2a   :  { %325 = vmatprep.subr.mxu0 %v497_v0  ;;  %360 = vmatprep.subr.mxu1 %v497_v0  ;;  %v176_v12 = vld [vmem:[#allocation8 + $0x58] sm:$0xff]  ;;  %v71_v13 = vld [vmem:[#allocation6 + $0x40] sm:$0xff]  ;;  %v175_v14 = vld [vmem:[#allocation8 + $0x50] sm:$0xff]  ;;  %p467_p1 = scmp.ne.s32.totalorder %s276_s7, %s466_s8  ;;  %p472_p3 = scmp.lt.s32.totalorder %s466_s8, %s466_s8 }
  0x2b   :  { %326 = vmatpush3.msra.mxu0 %v77_v2  ;;  %361 = vmatpush3.msra.mxu1 %v179_v7  ;;  %v70_v15 = vld [vmem:[#allocation6 + $0x38] sm:$0xff]  ;;  %v174_v16 = vld [vmem:[#allocation8 + $0x48] sm:$0xff]  ;;  %v69_v17 = vld [vmem:[#allocation6 + $0x30] sm:$0xff] }
  0x2c   :  { %327 = vmatprep.subr.mxu0 %v497_v0  ;;  %362 = vmatprep.subr.mxu1 %v497_v0  ;;  %v173_v18 = vld [vmem:[#allocation8 + $0x40] sm:$0xff]  ;;  %v68_v19 = vld [vmem:[#allocation6 + $0x28] sm:$0xff]  ;;  %v172_v20 = vld [vmem:[#allocation8 + $0x38] sm:$0xff]  ;;  %p473_p4 = por %p472_p3, %p471_p2 }
  0x2d   :  { %328 = vmatpush3.msra.mxu0 %v76_v3  ;;  %363 = vmatpush3.msra.mxu1 %v178_v8  ;;  %v67_v21 = vld [vmem:[#allocation6 + $0x20] sm:$0xff]  ;;  %v171_v23 = vld [vmem:[#allocation8 + $0x30] sm:$0xff]  ;;  %v66_v24 = vld [vmem:[#allocation6 + $0x18] sm:$0xff] }
  0x2e   :  { %329 = vmatprep.subr.mxu0 %v497_v0  ;;  %364 = vmatprep.subr.mxu1 %v497_v0  ;;  %v170_v25 = vld [vmem:[#allocation8 + $0x28] sm:$0xff]  ;;  %v65_v26 = vld [vmem:[#allocation6 + $0x10] sm:$0xff]  ;;  %v169_v28 = vld [vmem:[#allocation8 + $0x20] sm:$0xff]  ;;  %p474_p5 = pnand %p473_p4, %p467_p1 }
  0x2f   :  { %330 = vmatpush3.msra.mxu0 %v75_v4  ;;  %365 = vmatpush3.msra.mxu1 %v177_v10  ;;  %v64_v29 = vld [vmem:[#allocation6 + $0x8] sm:$0xff]  ;;  %v285_v30 = vld [vmem:[#allocation3] ss:$0 sm:$0xff]  ;;  %v63_v32 = vld [vmem:[#allocation6] sm:$0xff] }
  0x30   :  { %331 = vmatprep.subr.mxu0 %v497_v0  ;;  %366 = vmatprep.subr.mxu1 %v497_v0  ;;  %v168_v31 = vld [vmem:[#allocation8 + $0x18] sm:$0xff]  ;;  %vm85_vm1 = vcmp.eq.s32.totalorder %v80_v27, %v285_v30  ;;  %v167_v33 = vld [vmem:[#allocation8 + $0x10] sm:$0xff]  ;;  %v166_v34 = vld [vmem:[#allocation8 + $0x8] sm:$0xff] }
  0x31   :  { %332 = vmatpush3.msra.mxu0 %v74_v6  ;;  %367 = vmatpush3.msra.mxu1 %v176_v12  ;;  %v165_v36 = vld [vmem:[#allocation8] sm:$0xff]  ;;  %v288_v44 = vld [vmem:[%s579_s3] ss:$0 sm:$0xff] }
  0x32   :  { %333 = vmatprep.subr.mxu0 %v497_v0  ;;  %368 = vmatprep.subr.mxu1 %v497_v0 }
  0x33   :  { %334 = vmatpush3.msra.mxu0 %v73_v9  ;;  %369 = vmatpush3.msra.mxu1 %v175_v14 }
  0x34   :  { %335 = vmatprep.subr.mxu0 %v497_v0  ;;  %370 = vmatprep.subr.mxu1 %v497_v0 }
  0x35   :  { %336 = vmatpush3.msra.mxu0 %v72_v11  ;;  %371 = vmatpush3.msra.mxu1 %v174_v16 }
  0x36   :  { %337 = vmatprep.subr.mxu0 %v497_v0  ;;  %372 = vmatprep.subr.mxu1 %v497_v0 }
  0x37   :  { %338 = vmatpush3.msra.mxu0 %v71_v13  ;;  %373 = vmatpush3.msra.mxu1 %v173_v18 }
  0x38   :  { %339 = vmatprep.subr.mxu0 %v497_v0  ;;  %374 = vmatprep.subr.mxu1 %v497_v0 }
  0x39   :  { %340 = vmatpush3.msra.mxu0 %v70_v15  ;;  %375 = vmatpush3.msra.mxu1 %v172_v20 }
  0x3a   :  { %341 = vmatprep.subr.mxu0 %v497_v0  ;;  %376 = vmatprep.subr.mxu1 %v497_v0 }
  0x3b   :  { %342 = vmatpush3.msra.mxu0 %v69_v17  ;;  %377 = vmatpush3.msra.mxu1 %v171_v23 }
  0x3c   :  { %343 = vmatprep.subr.mxu0 %v497_v0  ;;  %378 = vmatprep.subr.mxu1 %v497_v0 }
  0x3d   :  { %344 = vmatpush3.msra.mxu0 %v68_v19  ;;  %379 = vmatpush3.msra.mxu1 %v170_v25 }
  0x3e   :  { %345 = vmatprep.subr.mxu0 %v497_v0  ;;  %380 = vmatprep.subr.mxu1 %v497_v0 }
  0x3f   :  { %346 = vmatpush3.msra.mxu0 %v67_v21  ;;  %381 = vmatpush3.msra.mxu1 %v169_v28 }
  0x40   :  { %347 = vmatprep.subr.mxu0 %v497_v0  ;;  %382 = vmatprep.subr.mxu1 %v497_v0 }
  0x41   :  { %348 = vmatpush3.msra.mxu0 %v66_v24  ;;  %383 = vmatpush3.msra.mxu1 %v168_v31 }
  0x42   :  { %349 = vmatprep.subr.mxu0 %v497_v0  ;;  %384 = vmatprep.subr.mxu1 %v497_v0 }
  0x43   :  { %350 = vmatpush3.msra.mxu0 %v65_v26  ;;  %385 = vmatpush3.msra.mxu1 %v167_v33 }
  0x44   :  { %351 = vmatprep.subr.mxu0 %v497_v0  ;;  %386 = vmatprep.subr.mxu1 %v497_v0 }
  0x45   :  { %352 = vmatpush3.msra.mxu0 %v64_v29  ;;  %387 = vmatpush3.msra.mxu1 %v166_v34 }
  0x46   :  { %353 = vmatprep.subr.mxu0 %v497_v0  ;;  %388 = vmatprep.subr.mxu1 %v497_v0 }
  0x47   :  { %354 = vmatpush3.msra.mxu0 %v63_v32  ;;  %389 = vmatpush3.msra.mxu1 %v165_v36 }
  0x48   :  { %356 = vmatmul.mubr.msk.f32.vlgmr.msra.gmra.mxu0 %vm85_vm1, %v499_v35  ;;  %403 = vset.pattern.permute.xlu0 %v500_v37 }
 0x108   :  { %v155_v38 = vpop.f32.mrf.mxu0 }
 0x109   :  { %v251_v39 = vmax.f32 %v155_v38, 1.0  ;;  %391 = vmatmul.mubr.f32.vlgmr.msra.gmra.mxu1 %v155_v38 }
 0x10a   :  { %v357_v40 = vpop.f32.mrf.mxu0 }
 0x10b   :  { %404 = vrcp.f32 %v251_v39 }
 0x118   :  { %v405_v41 = vpop.eup %404 }
 0x119   :  { %255 = vperm.xlu0 %403, %v405_v41  }
 0x194   :  { %v256_v42 = vpop.permute.xlu0 %255 }
 0x1c9   :  { %v247_v43 = vpop.f32.mrf.mxu1 }
 0x1ca   :  { %v258_v45 = vmul.f32 %v256_v42, %v247_v43 }
 0x1cb   :  { %v392_v46 = vpop.f32.mrf.mxu1 }
 0x1cc   :  { %v266_v47 = vadd.f32 %v288_v44, %v258_v45 }
 0x1ce   :  { %v267_v48 = vmax.f32 %v266_v47, 0.0 }
 0x1d0   :  { %268 = vst [vmem:[#allocation9] sm:$0xff] %v267_v48 }
 0x1d1   :  { %477 = shalt.err (!%p474_p5)
}
 0x1d2   :  { %278 = dma.vmem_to_hbm [thread:$0]  %s276_s7, 128, %s580_s4, [#allocation5]  }
 0x1d3   :  { %490 = dma.done.wait [#allocation5], 128  }
 0x1d4   :  { %491 = vsyncadd [#allocation5], 4294967168 }
 0x1d5   :  { %282 = vsyncpa [#allocation4], 1 }
 0x1d6   :  { %283 = vsyncpa [#allocation7], 1 }
 0x1d7   :  { %284 = vsyncpa [#allocation5], 1 }

</bundles_post_ra>
